<compile_context>
chip_gen: v6e
topology: v6e:2x2x1
jax: 0.10.0
libtpu: 0.0.40
codegen_flags: <defaults>
</compile_context>

<pallas_src>
import jax
import jax.numpy as jnp
from jax.experimental import pallas as pl
from jax.experimental.pallas import tpu as pltpu


# ----------------------------- Pallas kernel -------------------------------

def _gprgnn_kernel(temp_ref, xT_ref, w1_ref, b1_ref, w2_ref, b2_ref, adjT_ref,
                   zT_ref, xk_ref):
    """Fused GPRGNN forward in transposed (feature, node) layout.

    grid axis 0 = propagation step k in [0, K].
      k == 0 : x_0^T = W2 @ relu(W1 @ x^T + b1) + b2 ;  z^T  = temp[0] * x_0^T
      k >= 1 : x_k^T = x_{k-1}^T @ adj^T             ;  z^T += temp[k] * x_k^T
    x_k^T lives in VMEM scratch; z^T is the VMEM-resident output accumulator.
    """
    k = pl.program_id(0)

    @pl.when(k == 0)
    def _():
        # lin1 -> relu -> lin2 (eval-mode dropout is the identity)
        h = jnp.dot(w1_ref[...], xT_ref[...],
                    preferred_element_type=jnp.float32)
        h = jnp.maximum(h + b1_ref[...], 0.0)
        x0 = jnp.dot(w2_ref[...], h,
                     preferred_element_type=jnp.float32) + b2_ref[...]
        xk_ref[...] = x0
        zT_ref[...] = temp_ref[0] * x0

    @pl.when(k > 0)
    def _():
        # x_k = adj @ x_{k-1}   (transposed:  x_k^T = x_{k-1}^T @ adj^T)
        x_new = jnp.dot(xk_ref[...], adjT_ref[...],
                        preferred_element_type=jnp.float32)
        xk_ref[...] = x_new
        zT_ref[...] = zT_ref[...] + temp_ref[k] * x_new


# ------------------------------ host wrapper --------------------------------

def gprgnn_forward(x, adj, params, temp, *, K):
    """x: (N, in_c) node features, adj: (N, N) dense normalized adjacency,
    params: {'lin1': (W1,b1), 'lin2': (W2,b2)} in PyTorch (out,in)/(out,) layout,
    temp: (K+1,) GPR weights."""
    n, in_c = x.shape
    w1, b1 = params["lin1"]
    w2, b2 = params["lin2"]
    hidden = w1.shape[0]
    out_c = w2.shape[0]

    # One-time layout change: nodes onto the lane (last) axis.
    xT = jnp.asarray(x.T, jnp.float32)
    adjT = jnp.asarray(adj.T, jnp.float32)

    zT = pl.pallas_call(
        _gprgnn_kernel,
        out_shape=jax.ShapeDtypeStruct((out_c, n), jnp.float32),
        grid=(K + 1,),
        in_specs=[
            pl.BlockSpec(memory_space=pltpu.SMEM),             # temp (K+1,) scalars
            pl.BlockSpec((in_c, n), lambda k: (0, 0)),         # x^T   (resident)
            pl.BlockSpec((hidden, in_c), lambda k: (0, 0)),    # W1    (resident)
            pl.BlockSpec((hidden, 1), lambda k: (0, 0)),       # b1
            pl.BlockSpec((out_c, hidden), lambda k: (0, 0)),   # W2    (resident)
            pl.BlockSpec((out_c, 1), lambda k: (0, 0)),        # b2
            pl.BlockSpec((n, n), lambda k: (0, 0)),            # adj^T (resident)
        ],
        # constant block index across k  =>  z^T stays in VMEM as accumulator,
        # written back to HBM once at the end (single, lane-dense store slab).
        out_specs=pl.BlockSpec((out_c, n), lambda k: (0, 0)),
        scratch_shapes=[pltpu.VMEM((out_c, n), jnp.float32)],  # x_k^T carry
        compiler_params=pltpu.CompilerParams(
            dimension_semantics=("arbitrary",)),               # steps are sequential
    )(
        jnp.asarray(temp, jnp.float32),
        xT,
        jnp.asarray(w1, jnp.float32),
        jnp.asarray(b1, jnp.float32).reshape(-1, 1),
        jnp.asarray(w2, jnp.float32),
        jnp.asarray(b2, jnp.float32).reshape(-1, 1),
        adjT,
    )

    z = zT.T
    if z.shape[1] == 1:            # mirror torch's z.squeeze(1)
        z = z[:, 0]
    return z


# ----------------------------- pure-JAX reference ---------------------------

def gprgnn_reference(x, adj, params, temp, *, K):
    w1, b1 = params["lin1"]
    w2, b2 = params["lin2"]
    h = jnp.maximum(x @ w1.T + b1, 0.0)
    xk = h @ w2.T + b2
    z = temp[0] * xk
    for i in range(K):
        xk = adj @ xk
        z = z + temp[i + 1] * xk
    if z.shape[1] == 1:
        z = z[:, 0]
    return z


# ----------------------------------- main ------------------------------------

if __name__ == "__main__":
    in_channels, hidden_channels, out_channels = 16, 32, 8
    K, alpha = 10, 0.1
    n_nodes = 64

    key = jax.random.PRNGKey(0)
    key, kx, ka, kw1, kb1, kw2, kb2 = jax.random.split(key, 7)

    x = jax.random.normal(kx, (n_nodes, in_channels), jnp.float32)

    # Symmetric normalized dense adjacency with self loops: D^-1/2 (A+I) D^-1/2
    a = (jax.random.uniform(ka, (n_nodes, n_nodes)) < 0.1).astype(jnp.float32)
    a = jnp.maximum(a, a.T) + jnp.eye(n_nodes, dtype=jnp.float32)
    dinv = 1.0 / jnp.sqrt(a.sum(axis=1))
    adj = a * dinv[:, None] * dinv[None, :]

    # PyTorch nn.Linear default init (uniform(-1/sqrt(fan_in), +1/sqrt(fan_in)))
    bnd1 = 1.0 / float(in_channels) ** 0.5
    bnd2 = 1.0 / float(hidden_channels) ** 0.5
    w1 = jax.random.uniform(kw1, (hidden_channels, in_channels), jnp.float32,
                            -bnd1, bnd1)
    b1 = jax.random.uniform(kb1, (hidden_channels,), jnp.float32, -bnd1, bnd1)
    w2 = jax.random.uniform(kw2, (out_channels, hidden_channels), jnp.float32,
                            -bnd2, bnd2)
    b2 = jax.random.uniform(kb2, (out_channels,), jnp.float32, -bnd2, bnd2)
    params = {"lin1": (w1, b1), "lin2": (w2, b2)}

    # GPR temp weights, init='PPR':  temp[k] = alpha*(1-alpha)^k, temp[K]=(1-alpha)^K
    ks = jnp.arange(K + 1, dtype=jnp.float32)
    temp = alpha * (1.0 - alpha) ** ks
    temp = temp.at[-1].set((1.0 - alpha) ** K)

    out = gprgnn_forward(x, adj, params, temp, K=K)
    out = jax.block_until_ready(out)

    ref = gprgnn_reference(x, adj, params, temp, K=K)
    assert out.shape == (n_nodes, out_channels)
    assert jnp.allclose(out, ref, atol=1e-4, rtol=1e-4), "mismatch vs reference"

    print("KERNEL_OK")
</pallas_src>

<mosaic_0001>
module attributes {stable_mosaic.version = 11 : i64} {
  func.func @_gprgnn_kernel(%arg0: i32, %arg1: memref<11xf32, #tpu.memory_space<smem>>, %arg2: memref<16x64xf32, #tpu.memory_space<vmem>>, %arg3: memref<32x16xf32, #tpu.memory_space<vmem>>, %arg4: memref<32x1xf32, #tpu.memory_space<vmem>>, %arg5: memref<8x32xf32, #tpu.memory_space<vmem>>, %arg6: memref<8x1xf32, #tpu.memory_space<vmem>>, %arg7: memref<64x64xf32, #tpu.memory_space<vmem>>, %arg8: memref<8x64xf32, #tpu.memory_space<vmem>>, %arg9: memref<8x64xf32, #tpu.memory_space<vmem>>) attributes {dimension_semantics = [#tpu.dimension_semantics<arbitrary>], iteration_bounds = array<i64: 11>, scalar_prefetch = 0 : i64, scratch_operands = 1 : i64, tpu.core_type = #tpu.core_type<tc>, window_params = [{transform_indices = @transform_0, window_bounds = array<i64: 11>}, {pipeline_mode = #tpu.pipeline_mode<synchronous>, transform_indices = @transform_1, window_bounds = array<i64: 16, 64>}, {pipeline_mode = #tpu.pipeline_mode<synchronous>, transform_indices = @transform_2, window_bounds = array<i64: 32, 16>}, {pipeline_mode = #tpu.pipeline_mode<synchronous>, transform_indices = @transform_3, window_bounds = array<i64: 32, 1>}, {pipeline_mode = #tpu.pipeline_mode<synchronous>, transform_indices = @transform_4, window_bounds = array<i64: 8, 32>}, {pipeline_mode = #tpu.pipeline_mode<synchronous>, transform_indices = @transform_5, window_bounds = array<i64: 8, 1>}, {pipeline_mode = #tpu.pipeline_mode<synchronous>, transform_indices = @transform_6, window_bounds = array<i64: 64, 64>}, {pipeline_mode = #tpu.pipeline_mode<synchronous>, transform_indices = @transform_7, window_bounds = array<i64: 8, 64>}]} {
    %c0_i32 = arith.constant 0 : i32
    %0 = arith.cmpi eq, %arg0, %c0_i32 : i32
    %1 = arith.extui %0 : i1 to i32
    %c0_i32_0 = arith.constant 0 : i32
    %2 = arith.cmpi ne, %1, %c0_i32_0 : i32
    scf.if %2 {
      %c0 = arith.constant 0 : index
      %c0_3 = arith.constant 0 : index
      %6 = vector.load %arg3[%c0, %c0_3] : memref<32x16xf32, #tpu.memory_space<vmem>>, vector<32x16xf32>
      %c0_4 = arith.constant 0 : index
      %c0_5 = arith.constant 0 : index
      %7 = vector.load %arg2[%c0_4, %c0_5] : memref<16x64xf32, #tpu.memory_space<vmem>>, vector<16x64xf32>
      %cst = arith.constant dense<0.000000e+00> : vector<32x64xf32>
      %8 = tpu.matmul %6, %7, %cst {dimension_numbers = #tpu.dot_dimension_numbers<[1], [0], [0], [1], [0, 0, 1, 1], [], []>} : vector<32x16xf32>, vector<16x64xf32>, vector<32x64xf32> -> vector<32x64xf32>
      %c0_6 = arith.constant 0 : index
      %c0_7 = arith.constant 0 : index
      %9 = vector.load %arg4[%c0_6, %c0_7] : memref<32x1xf32, #tpu.memory_space<vmem>>, vector<32x1xf32>
      %10 = vector.broadcast %9 : vector<32x1xf32> to vector<32x64xf32>
      %11 = arith.addf %8, %10 : vector<32x64xf32>
      %cst_8 = arith.constant 0.000000e+00 : f32
      %12 = vector.broadcast %cst_8 : f32 to vector<32x64xf32>
      %13 = arith.maximumf %11, %12 : vector<32x64xf32>
      %c0_9 = arith.constant 0 : index
      %c0_10 = arith.constant 0 : index
      %14 = vector.load %arg5[%c0_9, %c0_10] : memref<8x32xf32, #tpu.memory_space<vmem>>, vector<8x32xf32>
      %cst_11 = arith.constant dense<0.000000e+00> : vector<8x64xf32>
      %15 = tpu.matmul %14, %13, %cst_11 {dimension_numbers = #tpu.dot_dimension_numbers<[1], [0], [0], [1], [0, 0, 1, 1], [], []>} : vector<8x32xf32>, vector<32x64xf32>, vector<8x64xf32> -> vector<8x64xf32>
      %c0_12 = arith.constant 0 : index
      %c0_13 = arith.constant 0 : index
      %16 = vector.load %arg6[%c0_12, %c0_13] : memref<8x1xf32, #tpu.memory_space<vmem>>, vector<8x1xf32>
      %17 = vector.broadcast %16 : vector<8x1xf32> to vector<8x64xf32>
      %18 = arith.addf %15, %17 : vector<8x64xf32>
      %c0_14 = arith.constant 0 : index
      %c0_15 = arith.constant 0 : index
      %19 = vector.load %arg9[%c0_14, %c0_15] : memref<8x64xf32, #tpu.memory_space<vmem>>, vector<8x64xf32>
      tpu.vector_store %arg9[%c0_14, %c0_15], %18 {strides = array<i32>} : memref<8x64xf32, #tpu.memory_space<vmem>>, vector<8x64xf32>,
      %c0_16 = arith.constant 0 : index
      %20 = memref.load %arg1[%c0_16] : memref<11xf32, #tpu.memory_space<smem>>
      %21 = vector.broadcast %20 : f32 to vector<8x64xf32>
      %22 = arith.mulf %21, %18 : vector<8x64xf32>
      %c0_17 = arith.constant 0 : index
      %c0_18 = arith.constant 0 : index
      %23 = vector.load %arg8[%c0_17, %c0_18] : memref<8x64xf32, #tpu.memory_space<vmem>>, vector<8x64xf32>
      tpu.vector_store %arg8[%c0_17, %c0_18], %22 {strides = array<i32>} : memref<8x64xf32, #tpu.memory_space<vmem>>, vector<8x64xf32>,
    } else {
    }
    %c0_i32_1 = arith.constant 0 : i32
    %3 = arith.cmpi sgt, %arg0, %c0_i32_1 : i32
    %4 = arith.extui %3 : i1 to i32
    %c0_i32_2 = arith.constant 0 : i32
    %5 = arith.cmpi ne, %4, %c0_i32_2 : i32
    scf.if %5 {
      %c0 = arith.constant 0 : index
      %c0_3 = arith.constant 0 : index
      %6 = vector.load %arg9[%c0, %c0_3] : memref<8x64xf32, #tpu.memory_space<vmem>>, vector<8x64xf32>
      %c0_4 = arith.constant 0 : index
      %c0_5 = arith.constant 0 : index
      %7 = vector.load %arg7[%c0_4, %c0_5] : memref<64x64xf32, #tpu.memory_space<vmem>>, vector<64x64xf32>
      %cst = arith.constant dense<0.000000e+00> : vector<8x64xf32>
      %8 = tpu.matmul %6, %7, %cst {dimension_numbers = #tpu.dot_dimension_numbers<[1], [0], [0], [1], [0, 0, 1, 1], [], []>} : vector<8x64xf32>, vector<64x64xf32>, vector<8x64xf32> -> vector<8x64xf32>
      %c0_6 = arith.constant 0 : index
      %c0_7 = arith.constant 0 : index
      %9 = vector.load %arg9[%c0_6, %c0_7] : memref<8x64xf32, #tpu.memory_space<vmem>>, vector<8x64xf32>
      tpu.vector_store %arg9[%c0_6, %c0_7], %8 {strides = array<i32>} : memref<8x64xf32, #tpu.memory_space<vmem>>, vector<8x64xf32>,
      %c0_8 = arith.constant 0 : index
      %c0_9 = arith.constant 0 : index
      %10 = vector.load %arg8[%c0_8, %c0_9] : memref<8x64xf32, #tpu.memory_space<vmem>>, vector<8x64xf32>
      %11 = arith.index_cast %arg0 : i32 to index
      %12 = memref.load %arg1[%11] : memref<11xf32, #tpu.memory_space<smem>>
      %13 = vector.broadcast %12 : f32 to vector<8x64xf32>
      %14 = arith.mulf %13, %8 : vector<8x64xf32>
      %15 = arith.addf %10, %14 : vector<8x64xf32>
      %c0_10 = arith.constant 0 : index
      %c0_11 = arith.constant 0 : index
      %16 = vector.load %arg8[%c0_10, %c0_11] : memref<8x64xf32, #tpu.memory_space<vmem>>, vector<8x64xf32>
      tpu.vector_store %arg8[%c0_10, %c0_11], %15 {strides = array<i32>} : memref<8x64xf32, #tpu.memory_space<vmem>>, vector<8x64xf32>,
    } else {
    }
    return
  }
  func.func @transform_0(%arg0: i32) -> i32 {
    %c0_i32 = arith.constant 0 : i32
    %c0_i32_0 = arith.constant 0 : i32
    return %c0_i32 : i32
  }
  func.func @transform_1(%arg0: i32) -> (i32, i32) {
    %c0_i32 = arith.constant 0 : i32
    %c0_i32_0 = arith.constant 0 : i32
    %c0_i32_1 = arith.constant 0 : i32
    return %c0_i32, %c0_i32_0 : i32, i32
  }
  func.func @transform_2(%arg0: i32) -> (i32, i32) {
    %c0_i32 = arith.constant 0 : i32
    %c0_i32_0 = arith.constant 0 : i32
    %c0_i32_1 = arith.constant 0 : i32
    return %c0_i32, %c0_i32_0 : i32, i32
  }
  func.func @transform_3(%arg0: i32) -> (i32, i32) {
    %c0_i32 = arith.constant 0 : i32
    %c0_i32_0 = arith.constant 0 : i32
    %c0_i32_1 = arith.constant 0 : i32
    return %c0_i32, %c0_i32_0 : i32, i32
  }
  func.func @transform_4(%arg0: i32) -> (i32, i32) {
    %c0_i32 = arith.constant 0 : i32
    %c0_i32_0 = arith.constant 0 : i32
    %c0_i32_1 = arith.constant 0 : i32
    return %c0_i32, %c0_i32_0 : i32, i32
  }
  func.func @transform_5(%arg0: i32) -> (i32, i32) {
    %c0_i32 = arith.constant 0 : i32
    %c0_i32_0 = arith.constant 0 : i32
    %c0_i32_1 = arith.constant 0 : i32
    return %c0_i32, %c0_i32_0 : i32, i32
  }
  func.func @transform_6(%arg0: i32) -> (i32, i32) {
    %c0_i32 = arith.constant 0 : i32
    %c0_i32_0 = arith.constant 0 : i32
    %c0_i32_1 = arith.constant 0 : i32
    return %c0_i32, %c0_i32_0 : i32, i32
  }
  func.func @transform_7(%arg0: i32) -> (i32, i32) {
    %c0_i32 = arith.constant 0 : i32
    %c0_i32_0 = arith.constant 0 : i32
    %c0_i32_1 = arith.constant 0 : i32
    return %c0_i32, %c0_i32_0 : i32, i32
  }
}

</mosaic_0001>

<bundles_post_ra>
// kernel: tpu_custom_call.1
= control target key start
LH: loop header
LB: loop body
LE: loop exit
PB: predicated region body
PF: predicated region fallthrough
CT: control target
= control target key end

     0   :  { %12 = vsyncpa [#allocation5], 0  ;;  %s946_s0 = inlined_call_operand.vmem [shape: f32[11], index: 0, kind: input, shape index: {}]   ;;  %s947_s1 = inlined_call_operand.vmem [shape: f32[16,64], index: 1, kind: input, shape index: {}]   ;;  %s948_s2 = inlined_call_operand.vmem [shape: f32[32,16], index: 2, kind: input, shape index: {}]   ;;  %s949_s3 = inlined_call_operand.vmem [shape: f32[32,1], index: 3, kind: input, shape index: {}]   ;;  %s950_s4 = inlined_call_operand.vmem [shape: f32[8,32], index: 4, kind: input, shape index: {}]   ;;  %s951_s5 = inlined_call_operand.vmem [shape: f32[8,1], index: 5, kind: input, shape index: {}]   ;;  %s952_s6 = inlined_call_operand.vmem [shape: f32[64,64], index: 6, kind: input, shape index: {}]   ;;  %s953_s7 = inlined_call_operand.hbm [shape: f32[8,64], index: 7, kind: output, shape index: {}]  }
   0x1   :  { %13 = vsyncpa [#allocation4], 0  ;;  %s834_s24 = smov 0  }
   0x2 LB: > { %s840_s25 = sadd.s32 4294967295, %s785_s24   ;;  %p623_p0 = scmp.ge.s32.totalorder %s785_s24, 1  ;;  %s785_s24 = sphi %s834_s24, %s19_s24  }
   0x3   : > { %p192_p1 = scmp.lt.s32.totalorder %s785_s24, 12  ;;  %s205_s28 = sshll.u32 %s946_s0, 4  ;;  %s206_s28 = int_to_ptr.vmem [resolvable:$true] %s205_s28 }
   0x4   : > { %p711_p4 = scmp.eq.s32.totalorder %s840_s25, 0  ;;  %s732_s30 = scalar_lea.vmem %s206_s28, 16 }
   0x5   : > { %p848_p3 = pnand %p623_p0, %p192_p1  ;;  %p733_p7 = scmp.ne.s32.totalorder %s206_s28, %s732_s30 }
   0x6   : > { %p740_p11 = scmp.lt.s32.totalorder %s206_s28, %s206_s28  ;;  %p741_p12 = scmp.lt.s32.totalorder %s732_s30, %s732_s30 }
   0x7   : > { %p707_p5 = pneg %p848_p3 }
   0x8   : > { %p742_p13 = por %p741_p12, %p740_p11 }
   0x9   : > { %p708_p6 = pnand %p711_p4, %p707_p5 }
   0xb   : > { %p734_p8 = pneg %p708_p6 }
   0xd   : > { %p735_p9 = pnand %p734_p8, %p733_p7 }
   0xf   : > { %p736_p10 = pneg %p735_p9 }
  0x11   : > { %p743_p2 = pnand %p742_p13, %p736_p10 }
  0x13   : > { %746 = shalt.err (!%p743_p2)
}
  0x14   : > { %s787_s8 = smov [#allocation3]   ;;  %236 = sbr.rel (%p848_p3) target bundleno = 683 (0x2ab), region = 48 }
  0x15   : > { %710 = dma.vmem_to_smem (!%p708_p6), %s206_s28, 16, %s787_s8, [#allocation5]  }
  0x19   : > { %776 = dma.done.wait (%p711_p4), [#allocation5], 16  }
  0x1a   : > { %778 = vsyncadd (%p711_p4), [#allocation5], 4294967280 }
  0x1b   : > { %242 = sfence }
  0x1c   : > { %p955_p0 = scmp.ne.s32.totalorder %s840_s25, 0 }
  0x1d   : > { %s478_s12 = sld [smem:[#allocation3]] (!%p955_p0) }
  0x1e   : > { %262 = sbr.rel (%p955_p0) target bundleno = 446 (0x1be), region = 56 }
  0x23   : > { %v268_v0 = vld [vmem:[%s947_s1 + $0x8] sm:$0xff]  ;;  %v267_v1 = vld [vmem:[%s947_s1] sm:$0xff]  ;;  %vm293_vm0 = vcmask 130048   ;;  %v788_v4 = vmov 0   ;;  %v272_v5 = vld [vmem:[%s949_s3 + $0x18] sm:$0xff]  ;;  %v789_v12 = vmov 0.0   ;;  %v479_v32 = vstv %s478_s12 }
  0x24   : > { %v263_v2 = vld [vmem:[%s948_s2] sm:$0xff]  ;;  %659 = vmatprep.subr.mxu0 %v268_v0  ;;  %v264_v3 = vld [vmem:[%s948_s2 + $0x8] sm:$0xff]  ;;  %730 = vset.pattern.permute.xlu0 %v788_v4  ;;  %v265_v7 = vld [vmem:[%s948_s2 + $0x10] sm:$0xff]  ;;  %vm790_vm1 = vmmov 0   ;;  %vm402_vm2 = vcmask 261120   ;;  %vm476_vm3 = vcmask 523264  }
  0x25   : > { %663 = vmatprep.mubr.msk.f32.mxu0 %vm293_vm0, %v263_v2  ;;  %660 = vmatpush3.msra.mxu0 %v268_v0  ;;  %v270_v6 = vld [vmem:[%s949_s3 + $0x8] sm:$0xff]  ;;  %v271_v8 = vld [vmem:[%s949_s3 + $0x10] sm:$0xff]  ;;  %v266_v9 = vld [vmem:[%s948_s2 + $0x18] sm:$0xff] }
  0x26   : > { %661 = vmatprep.subr.mxu0 %v267_v1  ;;  %290 = vperm.xlu0 %730, %v272_v5   ;;  %v269_v10 = vld [vmem:[%s949_s3] sm:$0xff] }
  0x27   : > { %662 = vmatpush3.msra.mxu0 %v267_v1  ;;  %731 = vset.pattern.permute.xlu1 %v788_v4  ;;  %v396_v11 = vld [vmem:[%s951_s5] sm:$0xff] }
  0x28   : > { %664 = vmatmul.mubr.msk.f32.vlgmr.msra.gmra.mxu0 %vm293_vm0, %v264_v3  ;;  %280 = vperm.xlu1 %731, %v270_v6   ;;  %v395_v29 = vld [vmem:[%s950_s4] sm:$0xff] }
  0x29   : > { %666 = vmatprep.mubr.msk.f32.mxu0 %vm293_vm0, %v265_v7  ;;  %669 = vmatprep.subr.mxu1 %v789_v12 }
  0x2a   : > { %285 = vperm.xlu0 %730, %v271_v8   ;;  %677 = vmatprep.mubr.msk.f32.mxu1 %vm790_vm1, %v789_v12 }
  0x2c   : > { %667 = vmatmul.mubr.msk.f32.gmra.mxu0 %vm293_vm0, %v266_v9  ;;  %275 = vperm.xlu1 %731, %v269_v10  }
  0x2e   : > { %399 = vperm.xlu0 %730, %v396_v11  }
  0xa1   : > { %v291_v13 = vpop.permute.xlu0 %290 }
  0xa3   : > { %v281_v14 = vpop.permute.xlu1 %280 }
  0xa5   : > { %v286_v18 = vpop.permute.xlu0 %285 }
  0xa7   : > { %v276_v20 = vpop.permute.xlu1 %275 }
  0xa9   : > { %v400_v30 = vpop.permute.xlu0 %399 }
  0xe8   : > { %v665_v15 = vpop.f32.mrf.mxu0 }
  0xe9   : > { %v378_v22 = vadd.f32 %v665_v15, %v281_v14 }
  0xea   : > { %v372_v16 = vpop.f32.mrf.mxu0 }
  0xeb   : > { %v373_v25 = vadd.f32 %v372_v16, %v276_v20  ;;  %v392_v27 = vmax.f32 %v378_v22, 0.0 }
  0xec   : > { %v668_v17 = vpop.f32.mrf.mxu0 }
  0xed   : > { %v388_v19 = vadd.f32 %v668_v17, %v291_v13  ;;  %v391_v28 = vmax.f32 %v373_v25, 0.0 }
  0xee   : > { %v382_v21 = vpop.f32.mrf.mxu0 }
  0xef   : > { %v394_v23 = vmax.f32 %v388_v19, 0.0  ;;  %v383_v24 = vadd.f32 %v382_v21, %v286_v18 }
  0xf1   : > { %v393_v26 = vmax.f32 %v383_v24, 0.0  ;;  %670 = vmatpush3.msra.mxu1 %v394_v23 }
  0xf2   : > { %671 = vmatprep.subr.mxu1 %v789_v12 }
  0xf3   : > { %672 = vmatpush3.msra.mxu1 %v393_v26 }
  0xf4   : > { %673 = vmatprep.subr.mxu1 %v789_v12 }
  0xf5   : > { %674 = vmatpush3.msra.mxu1 %v392_v27 }
  0xf6   : > { %675 = vmatprep.subr.mxu1 %v789_v12 }
  0xf7   : > { %676 = vmatpush3.msra.mxu1 %v391_v28 }
  0xf8   : > { %678 = vmatmul.mubr.msk.f32.vlgmr.msra.gmra.mxu1 %vm402_vm2, %v395_v29 }
 0x1b8   : > { %v472_v31 = vpop.f32.mrf.mxu1 }
 0x1b9   : > { %v473_v33 = vadd.f32 %v472_v31, %v400_v30 }
 0x1ba   : > { %v679_v34 = vpop.f32.mrf.mxu1 }
 0x1bb   : > { %477 = vst.msk [vmem:[#allocation2] sm:$0xff] %vm476_vm3, %v473_v33  ;;  %v480_v35 = vmul.f32 %v479_v32, %v473_v33 }
 0x1bd   : > { %481 = vst.msk [vmem:[#allocation6] sm:$0xff] %vm476_vm3, %v480_v35 }
 0x1be PF: > { %p633_p1 = scmp.le.s32.totalorder %s840_s25, 0 }
 0x1bf   : > { %s571_s8 = sld [smem:[#allocation3 + %s840_s25]] (!%p633_p1) }
 0x1c0   : > { %485 = sbr.rel (%p633_p1) target bundleno = 668 (0x29c), region = 60 }
 0x1c5   : > { %v494_v36 = vld [vmem:[%s952_s6 + $0x38] sm:$0xff]  ;;  %v791_v37 = vmov 0.0   ;;  %v493_v38 = vld [vmem:[%s952_s6 + $0x30] sm:$0xff]  ;;  %vm792_vm4 = vmmov 0   ;;  %v492_v39 = vld [vmem:[%s952_s6 + $0x28] sm:$0xff]  ;;  %vm495_vm5 = vcmask 523264   ;;  %v572_v46 = vstv %s571_s8 }
 0x1c6   : > { %680 = vmatprep.subr.mxu0 %v791_v37  ;;  %696 = vmatprep.mubr.msk.f32.mxu0 %vm792_vm4, %v791_v37  ;;  %v491_v40 = vld [vmem:[%s952_s6 + $0x20] sm:$0xff]  ;;  %v490_v41 = vld [vmem:[%s952_s6 + $0x18] sm:$0xff]  ;;  %v489_v42 = vld [vmem:[%s952_s6 + $0x10] sm:$0xff] }
 0x1c7   : > { %681 = vmatpush3.msra.mxu0 %v494_v36  ;;  %v488_v43 = vld [vmem:[%s952_s6 + $0x8] sm:$0xff]  ;;  %v487_v44 = vld [vmem:[%s952_s6] sm:$0xff] }
 0x1c8   : > { %682 = vmatprep.subr.mxu0 %v791_v37  ;;  %v486_v45 = vld [vmem:[#allocation2] sm:$0xff]  ;;  %v570_v48 = vld [vmem:[#allocation6] sm:$0xff] }
 0x1c9   : > { %683 = vmatpush3.msra.mxu0 %v493_v38 }
 0x1ca   : > { %684 = vmatprep.subr.mxu0 %v791_v37 }
 0x1cb   : > { %685 = vmatpush3.msra.mxu0 %v492_v39 }
 0x1cc   : > { %686 = vmatprep.subr.mxu0 %v791_v37 }
 0x1cd   : > { %687 = vmatpush3.msra.mxu0 %v491_v40 }
 0x1ce   : > { %688 = vmatprep.subr.mxu0 %v791_v37 }
 0x1cf   : > { %689 = vmatpush3.msra.mxu0 %v490_v41 }
 0x1d0   : > { %690 = vmatprep.subr.mxu0 %v791_v37 }
 0x1d1   : > { %691 = vmatpush3.msra.mxu0 %v489_v42 }
 0x1d2   : > { %692 = vmatprep.subr.mxu0 %v791_v37 }
 0x1d3   : > { %693 = vmatpush3.msra.mxu0 %v488_v43 }
 0x1d4   : > { %694 = vmatprep.subr.mxu0 %v791_v37 }
 0x1d5   : > { %695 = vmatpush3.msra.mxu0 %v487_v44 }
 0x1d6   : > { %697 = vmatmul.mubr.msk.f32.vlgmr.msra.gmra.mxu0 %vm495_vm5, %v486_v45 }
 0x296   : > { %v565_v47 = vpop.f32.mrf.mxu0 }
 0x297   : > { %569 = vst.msk [vmem:[#allocation2] sm:$0xff] %vm495_vm5, %v565_v47  ;;  %v573_v49 = vmul.f32 %v572_v46, %v565_v47 }
 0x298   : > { %v698_v50 = vpop.f32.mrf.mxu0 }
 0x299   : > { %v574_v51 = vadd.f32 %v573_v49, %v570_v48 }
 0x29b   : > { %575 = vst.msk [vmem:[#allocation6] sm:$0xff] %vm495_vm5, %v574_v51 }
 0x29c PF: > { %p713_p2 = scmp.eq.s32.totalorder %s840_s25, 10  ;;  %s793_s9 = smov [#allocation6]  }
 0x29d   : > { %s583_s10 = sshll.u32 %s793_s9, 4  ;;  %s584_s10 = int_to_ptr.vmem [resolvable:$true] %s583_s10 }
 0x29e   : > { %s747_s11 = scalar_lea.vmem %s584_s10, 128  ;;  %p754_p6 = scmp.lt.s32.totalorder %s584_s10, %s584_s10 }
 0x29f   : > { %p748_p3 = scmp.ne.s32.totalorder %s584_s10, %s747_s11  ;;  %p755_p7 = scmp.lt.s32.totalorder %s747_s11, %s747_s11 }
 0x2a1   : > { %p749_p4 = pnand %p748_p3, %p713_p2  ;;  %p756_p8 = por %p755_p7, %p754_p6 }
 0x2a3   : > { %p750_p5 = pneg %p749_p4 }
 0x2a5   : > { %p757_p9 = pnand %p756_p8, %p750_p5 }
 0x2a7   : > { %760 = shalt.err (!%p757_p9)
}
 0x2a8   : > { %704 = dma.vmem_to_hbm [thread:$0]  (%p713_p2), %s584_s10, 128, %s953_s7, [#allocation4]  }
 0x2a9   : > { %780 = dma.done.wait (%p713_p2), [#allocation4], 128  }
 0x2aa   : > { %782 = vsyncadd (%p713_p2), [#allocation4], 4294967168 }
 0x2ab PF: > { %s19_s24 = sadd.s32 1, %s785_s24  }
 0x2ac   : > { %p16_p10 = scmp.ge.s32.totalorder %s19_s24, 13  }
 0x2ae   :  { %18 = sbr.rel (!%p16_p10) target bundleno = 2 (0x2), region = 85 }
 0x2b3   :  { %596 = vsyncpa [#allocation4], 1 }
 0x2b4   :  { %598 = vsyncpa [#allocation4 + $0x1], 1 }
 0x2b5   :  { %599 = vsyncpa [#allocation5], 1 }
 0x2b6   :  { %601 = vsyncpa [#allocation5 + $0x1], 1 }

</bundles_post_ra>
